<compile_context>
chip_gen: v7x
topology: tpu7x:2x2x1
jax: 0.10.0
libtpu: 0.0.40
codegen_flags: <defaults>
</compile_context>

<pallas_src>
import jax
import jax.numpy as jnp
from jax.experimental import pallas as pl
from jax.experimental.pallas import tpu as pltpu

NEG_SLOPE = 0.01
_LANE = 128
_SUBLANE = 8
_MAX_TB = 4096                    # cap on batch-tile rows (budget gates it anyway)
_MIN_SPLIT_TB = 256               # only force >=2 grid steps if halves stay this big
_FEATURE_PAD_MAX_OVERHEAD = 1.25  # pad features to 128 only if <=25% inflation


def _round_up(x, m):
    return (x + m - 1) // m * m


def _vmem_budget_and_limit():
    """Generation-aware VMEM sizing: (tile-sizing budget, scoped vmem limit)."""
    cap = None
    try:
        info = pltpu.get_tpu_info()
        cap = getattr(info, "vmem_capacity_bytes", None)
    except Exception:
        cap = None
    if not cap or cap <= 0:
        cap = 64 * 1024 * 1024    # conservative default (v7x physical VMEM)
    cap = max(int(cap), 16 * 1024 * 1024)
    budget = (cap * 5) // 8       # ~40 MiB on v7x, ~80 MiB on v5e/v6e
    limit = (cap * 3) // 4        # ~48 MiB on v7x, ~96 MiB on v5e/v6e
    return budget, limit


def _make_dc_kernel(num_linears):
    """Kernel applying `num_linears` Linear layers with the DC activation
    pattern (LeakyReLU after every layer except the first)."""

    def kernel(*refs):
        # refs = (x_ref, w0, b0, w1, b1, ..., out_ref)
        x_ref = refs[0]
        o_ref = refs[-1]
        h = x_ref[...]
        for i in range(num_linears):
            w = refs[1 + 2 * i][...]
            b = refs[2 + 2 * i][...]
            # Native-dtype (bf16) MXU matmul with f32 accumulation.
            h = jnp.dot(h.astype(w.dtype), w, preferred_element_type=jnp.float32)
            h = h + b.astype(jnp.float32)
            if i > 0:  # matches `if i > 0: append(LeakyReLU)` in DC.__init__
                h = jnp.maximum(h, NEG_SLOPE * h)
        o_ref[...] = h.astype(o_ref.dtype)

    return kernel


def _pad_and_cast(x, params, compute_dtype):
    """Zero-pad layer widths to lane multiples and cast operands for the MXU.

    Returns (x_padded_cast, [(W_pad, b_pad), ...]).  Weights are cast to
    `compute_dtype`; biases stay float32 (added after f32 accumulation).
    Zero padding is exact: padded columns carry zero activations and padded
    weight rows are zero, so they never contribute to the real outputs.
    """
    features = x.shape[1]
    f_pad = _round_up(features, _LANE)
    if f_pad != features and f_pad > features * _FEATURE_PAD_MAX_OVERHEAD:
        f_pad = features  # don't inflate x DMA traffic for tiny feature dims

    padded = []
    in_dim, in_pad = features, f_pad
    for w, b in params:
        out_dim = w.shape[1]
        out_pad = _round_up(out_dim, _LANE)
        w_p = jnp.pad(w, ((0, in_pad - in_dim), (0, out_pad - out_dim)))
        b_p = jnp.pad(b, ((0, 0), (0, out_pad - out_dim)))
        padded.append((w_p.astype(compute_dtype), b_p.astype(jnp.float32)))
        in_dim, in_pad = out_dim, out_pad

    if f_pad != features:
        x = jnp.pad(x, ((0, 0), (0, f_pad - features)))
    return x.astype(compute_dtype), padded


def dc_forward(x, params, compute_dtype=jnp.bfloat16):
    """Run the DC forward pass as a single batch-tiled Pallas TPU kernel.

    x:      (batch, features)
    params: list of (W, b) with W: (in, out), b: (1, out)
    """
    num_linears = len(params)
    batch = x.shape[0]
    out_dim = params[-1][0].shape[1]
    out_dtype = x.dtype

    x_c, padded_params = _pad_and_cast(x, params, compute_dtype)
    f_dim = x_c.shape[1]
    out_pad = padded_params[-1][0].shape[1]

    flat = []
    weight_bytes = 0
    for w, b in padded_params:
        flat.extend([w, b])
        weight_bytes += w.size * w.dtype.itemsize + b.size * b.dtype.itemsize

    in_itemsize = jnp.dtype(compute_dtype).itemsize
    out_itemsize = jnp.dtype(out_dtype).itemsize
    max_width = max([f_dim] + [w.shape[1] for w, _ in padded_params])

    budget, vmem_limit = _vmem_budget_and_limit()
    kernel = _make_dc_kernel(num_linears)

    def build_and_call(single_buffer_weights):
        # Per-row VMEM cost: 2x double-buffered x tile + 2x out tile + ~2 live
        # f32 intermediate activations of the widest padded layer.
        per_row = (2 * f_dim * in_itemsize
                   + 2 * out_pad * out_itemsize
                   + 2 * max_width * 4)
        weight_factor = 1 if single_buffer_weights else 2
        # TODO(synk): if weight_factor*weight_bytes ever exceeds the budget, a
        # K-tiled (contraction-split) fallback with an f32 VMEM accumulator and
        # an 'arbitrary' grid axis would beat degrading to a minimal batch tile.
        avail = max(budget - weight_factor * weight_bytes, per_row * _SUBLANE)
        tb = int(avail // per_row)
        tb = max(_SUBLANE, (min(tb, _MAX_TB) // _SUBLANE) * _SUBLANE)
        tb = min(tb, _round_up(batch, _SUBLANE))

        # v7x megacore: give the "parallel" batch axis >= 2 steps when the
        # halves are still reasonably sized (harmless on 1-TC chips).
        if _round_up(batch, tb) // tb < 2:
            half = _round_up(-(-batch // 2), _SUBLANE)
            if half >= _MIN_SPLIT_TB:
                tb = min(tb, half)

        batch_pad = _round_up(batch, tb)
        x_p = x_c if batch_pad == batch else jnp.pad(
            x_c, ((0, batch_pad - batch), (0, 0)))
        grid = (batch_pad // tb,)

        def resident_spec(shape):
            # Constant index_map: block never changes across grid steps.
            if single_buffer_weights:
                return pl.BlockSpec(shape, lambda i: (0, 0),
                                    pipeline_mode=pl.Buffered(1))
            return pl.BlockSpec(shape, lambda i: (0, 0))

        in_specs = [pl.BlockSpec((tb, f_dim), lambda i: (i, 0))]
        for w, b in padded_params:
            in_specs.append(resident_spec(w.shape))
            in_specs.append(resident_spec(b.shape))
        out_specs = pl.BlockSpec((tb, out_pad), lambda i: (i, 0))

        flops = sum(2 * batch_pad * w.shape[0] * w.shape[1]
                    for w, _ in padded_params)
        bytes_accessed = (batch_pad * f_dim * in_itemsize + weight_bytes
                          + batch_pad * out_pad * out_itemsize)
        cost = pl.CostEstimate(flops=flops, transcendentals=0,
                               bytes_accessed=bytes_accessed)

        return pl.pallas_call(
            kernel,
            grid=grid,
            in_specs=in_specs,
            out_specs=out_specs,
            out_shape=jax.ShapeDtypeStruct((batch_pad, out_pad), out_dtype),
            compiler_params=pltpu.CompilerParams(
                dimension_semantics=("parallel",),
                vmem_limit_bytes=vmem_limit,
            ),
            cost_estimate=cost,
        )(x_p, *flat)

    try:
        out = build_and_call(single_buffer_weights=True)
    except Exception:
        # pl.Buffered(1) single-buffering unavailable/rejected on this jax
        # version: fall back to default double-buffered resident weights.
        out = build_and_call(single_buffer_weights=False)

    # Drop batch padding and the zero-padded output lanes.
    return out[:batch, :out_dim]


def init_dc_params(key, features, pos_tags, hidden_layers):
    """Deterministic init mimicking torch.nn.Linear default:
    U(-1/sqrt(fan_in), 1/sqrt(fan_in)) for both weights and biases."""
    dims = [features] + list(hidden_layers) + [pos_tags]
    params = []
    for i in range(len(dims) - 1):
        fan_in, fan_out = dims[i], dims[i + 1]
        key, kw, kb = jax.random.split(key, 3)
        bound = 1.0 / jnp.sqrt(jnp.float32(fan_in))
        w = jax.random.uniform(kw, (fan_in, fan_out), jnp.float32, -bound, bound)
        b = jax.random.uniform(kb, (1, fan_out), jnp.float32, -bound, bound)
        params.append((w, b))
    return params


def dc_reference(x, params):
    """Pure-JAX f32 reference of the same forward pass (for sanity checking)."""
    h = x
    for i, (w, b) in enumerate(params):
        h = h @ w + b
        if i > 0:
            h = jnp.where(h >= 0, h, NEG_SLOPE * h)
    return h


if __name__ == "__main__":
    # Small shapes consistent with the module: probe hidden states of size 32
    # into 8 POS tags with one hidden layer of 16. batch=12 also exercises the
    # batch-padding / lane-padding / output-slicing paths.
    batch, features, hidden, pos_tags = 12, 32, 16, 8

    key = jax.random.PRNGKey(0)
    key, kx = jax.random.split(key)
    x = jax.random.normal(kx, (batch, features), jnp.float32)

    params = init_dc_params(key, features, pos_tags, hidden_layers=[hidden])

    out = dc_forward(x, params)
    out = jax.block_until_ready(out)

    ref = dc_reference(x, params)
    assert out.shape == (batch, pos_tags)
    # bf16 MXU operands with f32 accumulation -> loose tolerance vs f32 ref.
    assert jnp.allclose(out, ref, atol=5e-2, rtol=5e-2), "mismatch vs reference"

    print("KERNEL_OK")
</pallas_src>

<mosaic_0001>
module attributes {stable_mosaic.version = 11 : i64} {
  func.func @kernel(%arg0: i32, %arg1: memref<16x32xbf16, #tpu.memory_space<vmem>>, %arg2: memref<32x128xbf16, #tpu.memory_space<vmem>>, %arg3: memref<1x128xf32, #tpu.memory_space<vmem>>, %arg4: memref<128x128xbf16, #tpu.memory_space<vmem>>, %arg5: memref<1x128xf32, #tpu.memory_space<vmem>>, %arg6: memref<16x128xf32, #tpu.memory_space<vmem>>) attributes {dimension_semantics = [#tpu.dimension_semantics<parallel>], iteration_bounds = array<i64: 1>, scalar_prefetch = 0 : i64, scratch_operands = 0 : i64, tpu.core_type = #tpu.core_type<tc>, window_params = [{transform_indices = @transform_0, window_bounds = array<i64: 16, 32>}, {pipeline_mode = #tpu.pipeline_mode<synchronous>, transform_indices = @transform_1, window_bounds = array<i64: 32, 128>}, {pipeline_mode = #tpu.pipeline_mode<synchronous>, transform_indices = @transform_2, window_bounds = array<i64: 1, 128>}, {pipeline_mode = #tpu.pipeline_mode<synchronous>, transform_indices = @transform_3, window_bounds = array<i64: 128, 128>}, {pipeline_mode = #tpu.pipeline_mode<synchronous>, transform_indices = @transform_4, window_bounds = array<i64: 1, 128>}, {transform_indices = @transform_5, window_bounds = array<i64: 16, 128>}]} {
    %c0 = arith.constant 0 : index
    %c0_0 = arith.constant 0 : index
    %0 = vector.load %arg1[%c0, %c0_0] : memref<16x32xbf16, #tpu.memory_space<vmem>>, vector<16x32xbf16>
    %c0_1 = arith.constant 0 : index
    %c0_2 = arith.constant 0 : index
    %1 = vector.load %arg2[%c0_1, %c0_2] : memref<32x128xbf16, #tpu.memory_space<vmem>>, vector<32x128xbf16>
    %c0_3 = arith.constant 0 : index
    %c0_4 = arith.constant 0 : index
    %2 = vector.load %arg3[%c0_3, %c0_4] : memref<1x128xf32, #tpu.memory_space<vmem>>, vector<1x128xf32>
    %cst = arith.constant dense<0.000000e+00> : vector<16x128xf32>
    %3 = tpu.matmul %0, %1, %cst {dimension_numbers = #tpu.dot_dimension_numbers<[1], [0], [0], [1], [0, 0, 1, 1], [], []>} : vector<16x32xbf16>, vector<32x128xbf16>, vector<16x128xf32> -> vector<16x128xf32>
    %4 = vector.broadcast %2 : vector<1x128xf32> to vector<16x128xf32>
    %5 = arith.addf %3, %4 : vector<16x128xf32>
    %c0_5 = arith.constant 0 : index
    %c0_6 = arith.constant 0 : index
    %6 = vector.load %arg4[%c0_5, %c0_6] : memref<128x128xbf16, #tpu.memory_space<vmem>>, vector<128x128xbf16>
    %c0_7 = arith.constant 0 : index
    %c0_8 = arith.constant 0 : index
    %7 = vector.load %arg5[%c0_7, %c0_8] : memref<1x128xf32, #tpu.memory_space<vmem>>, vector<1x128xf32>
    %8 = arith.truncf %5 : vector<16x128xf32> to vector<16x128xbf16>
    %cst_9 = arith.constant dense<0.000000e+00> : vector<16x128xf32>
    %9 = tpu.matmul %8, %6, %cst_9 {dimension_numbers = #tpu.dot_dimension_numbers<[1], [0], [0], [1], [0, 0, 1, 1], [], []>} : vector<16x128xbf16>, vector<128x128xbf16>, vector<16x128xf32> -> vector<16x128xf32>
    %10 = vector.broadcast %7 : vector<1x128xf32> to vector<16x128xf32>
    %11 = arith.addf %9, %10 : vector<16x128xf32>
    %cst_10 = arith.constant 0.00999999977 : f32
    %12 = vector.broadcast %cst_10 : f32 to vector<16x128xf32>
    %13 = arith.mulf %12, %11 : vector<16x128xf32>
    %14 = arith.maximumf %11, %13 : vector<16x128xf32>
    %c0_11 = arith.constant 0 : index
    %c0_12 = arith.constant 0 : index
    %15 = vector.load %arg6[%c0_11, %c0_12] : memref<16x128xf32, #tpu.memory_space<vmem>>, vector<16x128xf32>
    tpu.vector_store %arg6[%c0_11, %c0_12], %14 {strides = array<i32>} : memref<16x128xf32, #tpu.memory_space<vmem>>, vector<16x128xf32>,
    return
  }
  func.func @transform_0(%arg0: i32) -> (i32, i32) {
    %c0_i32 = arith.constant 0 : i32
    %c0_i32_0 = arith.constant 0 : i32
    return %arg0, %c0_i32 : i32, i32
  }
  func.func @transform_1(%arg0: i32) -> (i32, i32) {
    %c0_i32 = arith.constant 0 : i32
    %c0_i32_0 = arith.constant 0 : i32
    %c0_i32_1 = arith.constant 0 : i32
    return %c0_i32, %c0_i32_0 : i32, i32
  }
  func.func @transform_2(%arg0: i32) -> (i32, i32) {
    %c0_i32 = arith.constant 0 : i32
    %c0_i32_0 = arith.constant 0 : i32
    %c0_i32_1 = arith.constant 0 : i32
    return %c0_i32, %c0_i32_0 : i32, i32
  }
  func.func @transform_3(%arg0: i32) -> (i32, i32) {
    %c0_i32 = arith.constant 0 : i32
    %c0_i32_0 = arith.constant 0 : i32
    %c0_i32_1 = arith.constant 0 : i32
    return %c0_i32, %c0_i32_0 : i32, i32
  }
  func.func @transform_4(%arg0: i32) -> (i32, i32) {
    %c0_i32 = arith.constant 0 : i32
    %c0_i32_0 = arith.constant 0 : i32
    %c0_i32_1 = arith.constant 0 : i32
    return %c0_i32, %c0_i32_0 : i32, i32
  }
  func.func @transform_5(%arg0: i32) -> (i32, i32) {
    %c0_i32 = arith.constant 0 : i32
    %c0_i32_0 = arith.constant 0 : i32
    return %arg0, %c0_i32 : i32, i32
  }
}

module attributes {stable_mosaic.version = 11 : i64} {
  func.func @kernel(%arg0: i32, %arg1: memref<16x32xbf16, #tpu.memory_space<vmem>>, %arg2: memref<32x128xbf16, #tpu.memory_space<vmem>>, %arg3: memref<1x128xf32, #tpu.memory_space<vmem>>, %arg4: memref<128x128xbf16, #tpu.memory_space<vmem>>, %arg5: memref<1x128xf32, #tpu.memory_space<vmem>>, %arg6: memref<16x128xf32, #tpu.memory_space<vmem>>) attributes {dimension_semantics = [#tpu.dimension_semantics<parallel>], iteration_bounds = array<i64: 1>, scalar_prefetch = 0 : i64, scratch_operands = 0 : i64, tpu.core_type = #tpu.core_type<tc>, window_params = [{transform_indices = @transform_0, window_bounds = array<i64: 16, 32>}, {pipeline_mode = #tpu.pipeline_mode<synchronous>, transform_indices = @transform_1, window_bounds = array<i64: 32, 128>}, {pipeline_mode = #tpu.pipeline_mode<synchronous>, transform_indices = @transform_2, window_bounds = array<i64: 1, 128>}, {pipeline_mode = #tpu.pipeline_mode<synchronous>, transform_indices = @transform_3, window_bounds = array<i64: 128, 128>}, {pipeline_mode = #tpu.pipeline_mode<synchronous>, transform_indices = @transform_4, window_bounds = array<i64: 1, 128>}, {transform_indices = @transform_5, window_bounds = array<i64: 16, 128>}]} {
    %c0 = arith.constant 0 : index
    %c0_0 = arith.constant 0 : index
    %0 = vector.load %arg1[%c0, %c0_0] : memref<16x32xbf16, #tpu.memory_space<vmem>>, vector<16x32xbf16>
    %c0_1 = arith.constant 0 : index
    %c0_2 = arith.constant 0 : index
    %1 = vector.load %arg2[%c0_1, %c0_2] : memref<32x128xbf16, #tpu.memory_space<vmem>>, vector<32x128xbf16>
    %c0_3 = arith.constant 0 : index
    %c0_4 = arith.constant 0 : index
    %2 = vector.load %arg3[%c0_3, %c0_4] : memref<1x128xf32, #tpu.memory_space<vmem>>, vector<1x128xf32>
    %cst = arith.constant dense<0.000000e+00> : vector<16x128xf32>
    %3 = tpu.matmul %0, %1, %cst {dimension_numbers = #tpu.dot_dimension_numbers<[1], [0], [0], [1], [0, 0, 1, 1], [], []>} : vector<16x32xbf16>, vector<32x128xbf16>, vector<16x128xf32> -> vector<16x128xf32>
    %4 = vector.broadcast %2 : vector<1x128xf32> to vector<16x128xf32>
    %5 = arith.addf %3, %4 : vector<16x128xf32>
    %c0_5 = arith.constant 0 : index
    %c0_6 = arith.constant 0 : index
    %6 = vector.load %arg4[%c0_5, %c0_6] : memref<128x128xbf16, #tpu.memory_space<vmem>>, vector<128x128xbf16>
    %c0_7 = arith.constant 0 : index
    %c0_8 = arith.constant 0 : index
    %7 = vector.load %arg5[%c0_7, %c0_8] : memref<1x128xf32, #tpu.memory_space<vmem>>, vector<1x128xf32>
    %8 = arith.truncf %5 : vector<16x128xf32> to vector<16x128xbf16>
    %cst_9 = arith.constant dense<0.000000e+00> : vector<16x128xf32>
    %9 = tpu.matmul %8, %6, %cst_9 {dimension_numbers = #tpu.dot_dimension_numbers<[1], [0], [0], [1], [0, 0, 1, 1], [], []>} : vector<16x128xbf16>, vector<128x128xbf16>, vector<16x128xf32> -> vector<16x128xf32>
    %10 = vector.broadcast %7 : vector<1x128xf32> to vector<16x128xf32>
    %11 = arith.addf %9, %10 : vector<16x128xf32>
    %cst_10 = arith.constant 0.00999999977 : f32
    %12 = vector.broadcast %cst_10 : f32 to vector<16x128xf32>
    %13 = arith.mulf %12, %11 : vector<16x128xf32>
    %14 = arith.maximumf %11, %13 : vector<16x128xf32>
    %c0_11 = arith.constant 0 : index
    %c0_12 = arith.constant 0 : index
    %15 = vector.load %arg6[%c0_11, %c0_12] : memref<16x128xf32, #tpu.memory_space<vmem>>, vector<16x128xf32>
    tpu.vector_store %arg6[%c0_11, %c0_12], %14 {strides = array<i32>} : memref<16x128xf32, #tpu.memory_space<vmem>>, vector<16x128xf32>,
    return
  }
  func.func @transform_0(%arg0: i32) -> (i32, i32) {
    %c0_i32 = arith.constant 0 : i32
    %c0_i32_0 = arith.constant 0 : i32
    return %arg0, %c0_i32 : i32, i32
  }
  func.func @transform_1(%arg0: i32) -> (i32, i32) {
    %c0_i32 = arith.constant 0 : i32
    %c0_i32_0 = arith.constant 0 : i32
    %c0_i32_1 = arith.constant 0 : i32
    return %c0_i32, %c0_i32_0 : i32, i32
  }
  func.func @transform_2(%arg0: i32) -> (i32, i32) {
    %c0_i32 = arith.constant 0 : i32
    %c0_i32_0 = arith.constant 0 : i32
    %c0_i32_1 = arith.constant 0 : i32
    return %c0_i32, %c0_i32_0 : i32, i32
  }
  func.func @transform_3(%arg0: i32) -> (i32, i32) {
    %c0_i32 = arith.constant 0 : i32
    %c0_i32_0 = arith.constant 0 : i32
    %c0_i32_1 = arith.constant 0 : i32
    return %c0_i32, %c0_i32_0 : i32, i32
  }
  func.func @transform_4(%arg0: i32) -> (i32, i32) {
    %c0_i32 = arith.constant 0 : i32
    %c0_i32_0 = arith.constant 0 : i32
    %c0_i32_1 = arith.constant 0 : i32
    return %c0_i32, %c0_i32_0 : i32, i32
  }
  func.func @transform_5(%arg0: i32) -> (i32, i32) {
    %c0_i32 = arith.constant 0 : i32
    %c0_i32_0 = arith.constant 0 : i32
    return %arg0, %c0_i32 : i32, i32
  }
}

</mosaic_0001>

<bundles_post_ra>
// kernel: tpu_custom_call.1
= control target key start
LH: loop header
LB: loop body
LE: loop exit
PB: predicated region body
PF: predicated region fallthrough
CT: control target
= control target key end

     0   :  { %10 = vsyncpa [#allocation3], 0  ;;  %s554_s0 = inlined_call_operand.hbm [shape: bf16[16,32], index: 0, kind: input, shape index: {}]   ;;  %s555_s1 = inlined_call_operand.hbm [shape: bf16[32,128], index: 1, kind: input, shape index: {}]   ;;  %s556_s2 = inlined_call_operand.vmem [shape: f32[1,128], index: 2, kind: input, shape index: {}]   ;;  %s557_s3 = inlined_call_operand.hbm [shape: bf16[128,128], index: 3, kind: input, shape index: {}]   ;;  %s558_s4 = inlined_call_operand.vmem [shape: f32[1,128], index: 4, kind: input, shape index: {}]   ;;  %s559_s5 = inlined_call_operand.hbm [shape: f32[16,128], index: 5, kind: output, shape index: {}]  }
   0x1   :  { %11 = vsyncpa [#allocation6], 0 }
   0x2   :  { %12 = vsyncpa [#allocation4], 0  ;;  %s444_s18 = smov [#allocation5]   ;;  %s445_s20 = smov [#allocation2]  }
   0x3   :  { %s30_s19 = sshll.u32 %s444_s18, 4  ;;  %s18_s21 = sshll.u32 %s445_s20, 4  ;;  %s31_s19 = int_to_ptr.vmem [resolvable:$true] %s30_s19  ;;  %s484_s21 = int_to_ptr.vmem [resolvable:$true] %s18_s21 }
   0x4   :  { %s350_s24 = scalar_lea.hbm %s555_s1, 256 }
   0x5   :  { %p351_p0 = scmp.ne.s32.totalorder %s555_s1, %s350_s24  ;;  %p354_p1 = scmp.lt.u32.totalorder %s350_s24, %s555_s1 }
   0x7   :  { %p356_p2 = pnand %p354_p1, %p351_p0 }
   0x9   :  { %359 = shalt.err (!%p356_p2)
}
   0xa   :  { %s360_s29 = scalar_lea.vmem %s31_s19, 256  ;;  %p365_p4 = scmp.lt.s32.totalorder %s31_s19, %s31_s19 }
   0xb   :  { %p361_p3 = scmp.ne.s32.totalorder %s31_s19, %s360_s29  ;;  %p366_p5 = scmp.lt.s32.totalorder %s360_s29, %s360_s29 }
   0xd   :  { %p367_p6 = por %p366_p5, %p365_p4 }
   0xf   :  { %p368_p7 = pnand %p367_p6, %p361_p3 }
  0x11   :  { %371 = shalt.err (!%p368_p7)
}
  0x12   :  { %s446_s30 = smov 64   ;;  %s447_s6 = smov 4  }
  0x13   :  { %36 = dma.hbm_to_vmem [thread:$0]  %s555_s1, 256, %s31_s19, [#allocation6], %s446_s30, %s446_s30, %s447_s6  }
  0x14   :  { %s372_s11 = scalar_lea.hbm %s554_s0, 128 }
  0x15   :  { %p373_p8 = scmp.ne.s32.totalorder %s554_s0, %s372_s11  ;;  %p376_p9 = scmp.lt.u32.totalorder %s372_s11, %s554_s0 }
  0x17   :  { %p378_p10 = pnand %p376_p9, %p373_p8 }
  0x19   :  { %381 = shalt.err (!%p378_p10)
}
  0x1a   :  { %s382_s16 = scalar_lea.vmem %s484_s21, 128  ;;  %p387_p12 = scmp.lt.s32.totalorder %s484_s21, %s484_s21 }
  0x1b   :  { %p383_p11 = scmp.ne.s32.totalorder %s484_s21, %s382_s16  ;;  %p388_p13 = scmp.lt.s32.totalorder %s382_s16, %s382_s16 }
  0x1d   :  { %p389_p0 = por %p388_p13, %p387_p12 }
  0x1f   :  { %p390_p1 = pnand %p389_p0, %p383_p11 }
  0x21   :  { %393 = shalt.err (!%p390_p1)
}
  0x22   :  { %24 = dma.hbm_to_vmem [thread:$0]  %s554_s0, 128, %s484_s21, [#allocation3], %s446_s30, %s446_s30, %s447_s6  }
  0x23   :  { %s448_s18 = smov [#allocation7]   ;;  %s394_s23 = scalar_lea.hbm %s557_s3, 1024 }
  0x24   :  { %s44_s19 = sshll.u32 %s448_s18, 4  ;;  %p395_p2 = scmp.ne.s32.totalorder %s557_s3, %s394_s23  ;;  %s45_s19 = int_to_ptr.vmem [resolvable:$true] %s44_s19 }
  0x25   :  { %p398_p3 = scmp.lt.u32.totalorder %s394_s23, %s557_s3 }
  0x27   :  { %p400_p4 = pnand %p398_p3, %p395_p2 }
  0x29   :  { %403 = shalt.err (!%p400_p4)
}
  0x2a   :  { %s404_s28 = scalar_lea.vmem %s45_s19, 1024  ;;  %p409_p6 = scmp.lt.s32.totalorder %s45_s19, %s45_s19 }
  0x2b   :  { %p405_p5 = scmp.ne.s32.totalorder %s45_s19, %s404_s28  ;;  %p410_p7 = scmp.lt.s32.totalorder %s404_s28, %s404_s28 }
  0x2d   :  { %p411_p8 = por %p410_p7, %p409_p6 }
  0x2f   :  { %p412_p9 = pnand %p411_p8, %p405_p5 }
  0x31   :  { %415 = shalt.err (!%p412_p9)
}
  0x32   :  { %50 = dma.hbm_to_vmem [thread:$0]  %s557_s3, 1024, %s45_s19, [#allocation6], %s446_s30, %s446_s30, %s447_s6  }
  0x33   :  { %438 = dma.done.wait [#allocation3], 128  }
  0x34   :  { %439 = vsyncadd [#allocation3], 4294967168 }
  0x35   :  { %440 = dma.done.wait [#allocation6], 1280  }
  0x36   :  { %441 = vsyncadd [#allocation6], 4294966016  ;;  %v449_v0 = vmov 0.0   ;;  %vm450_vm0 = vmmov 0   ;;  %v339_v1 = vld [vmem:[#allocation5] sm:$0xff]   ;;  %v340_v2 = vld [vmem:[#allocation5 + $0x8] sm:$0xff]  }
  0x37   :  { %301 = vmatprep.subr.bf16.mxu0 %v449_v0  ;;  %305 = vmatprep.mubr.msk.bf16.mxu0 %vm450_vm0, %v449_v0  ;;  %v342_v3 = vld [vmem:[#allocation7] sm:$0xff]   ;;  %v341_v4 = vld [vmem:[#allocation2] sm:$0xff]   ;;  %vm93_vm1 = vcmask 261120   ;;  %v344_v6 = vld [vmem:[#allocation7 + $0x10] sm:$0xff]  }
  0x38   :  { %309 = vmatprep.subr.bf16.mxu1 %v449_v0  ;;  %325 = vmatprep.mubr.msk.bf16.mxu1 %vm450_vm0, %v449_v0  ;;  %v343_v5 = vld [vmem:[#allocation7 + $0x8] sm:$0xff]   ;;  %v345_v7 = vld [vmem:[#allocation7 + $0x18] sm:$0xff]   ;;  %v346_v8 = vld [vmem:[#allocation7 + $0x20] sm:$0xff]  }
  0x39   :  { %302 = vmatpush3.bf16.msra.mxu0 %v339_v1  ;;  %310 = vmatpush3.bf16.msra.mxu1 %v342_v3  ;;  %v347_v9 = vld [vmem:[#allocation7 + $0x28] sm:$0xff]   ;;  %v348_v10 = vld [vmem:[#allocation7 + $0x30] sm:$0xff]   ;;  %v349_v11 = vld [vmem:[#allocation7 + $0x38] sm:$0xff]  }
  0x3a   :  { %303 = vmatprep.subr.bf16.mxu0 %v449_v0  ;;  %311 = vmatprep.subr.bf16.mxu1 %v449_v0  ;;  %v275_v12 = vld [vmem:[%s556_s2] ss:$0 sm:$0xff]  ;;  %s451_s2 = smov [#allocation8]  }
  0x3b   :  { %v280_v20 = vld [vmem:[%s558_s4] ss:$0 sm:$0xff]  ;;  %s262_s7 = sshll.u32 %s451_s2, 4  ;;  %s263_s7 = int_to_ptr.vmem [resolvable:$true] %s262_s7 }
  0x3c   :  { %s416_s8 = scalar_lea.vmem %s263_s7, 256  ;;  %p421_p11 = scmp.lt.s32.totalorder %s263_s7, %s263_s7 }
  0x3d   :  { %304 = vmatpush3.bf16.msra.mxu0 %v340_v2  ;;  %312 = vmatpush3.bf16.msra.mxu1 %v343_v5  ;;  %p417_p10 = scmp.ne.s32.totalorder %s263_s7, %s416_s8  ;;  %p422_p12 = scmp.lt.s32.totalorder %s416_s8, %s416_s8 }
  0x3e   :  { %313 = vmatprep.subr.bf16.mxu1 %v449_v0 }
  0x3f   :  { %p423_p13 = por %p422_p12, %p421_p11 }
  0x40   :  { %306 = vmatmul.mubr.msk.bf16.vlgmr.msra.gmra.mrb[0].mxu0 %vm93_vm1, %v341_v4 }
  0x41   :  { %314 = vmatpush3.bf16.msra.mxu1 %v344_v6  ;;  %p424_p0 = pnand %p423_p13, %p417_p10 }
  0x42   :  { %315 = vmatprep.subr.bf16.mxu1 %v449_v0 }
  0x45   :  { %316 = vmatpush3.bf16.msra.mxu1 %v345_v7 }
  0x46   :  { %317 = vmatprep.subr.bf16.mxu1 %v449_v0 }
  0x49   :  { %318 = vmatpush3.bf16.msra.mxu1 %v346_v8 }
  0x4a   :  { %319 = vmatprep.subr.bf16.mxu1 %v449_v0 }
  0x4d   :  { %320 = vmatpush3.bf16.msra.mxu1 %v347_v9 }
  0x4e   :  { %321 = vmatprep.subr.bf16.mxu1 %v449_v0 }
  0x51   :  { %322 = vmatpush3.bf16.msra.mxu1 %v348_v10 }
  0x52   :  { %323 = vmatprep.subr.bf16.mxu1 %v449_v0 }
  0x55   :  { %324 = vmatpush3.bf16.msra.mxu1 %v349_v11 }
 0x113   :  { %v131_v13 = vpop.f32.mrb[0].mxu0 }
 0x114   :  { %v307_v14 = vpop.f32.mrb[1].mxu0  ;;  %v132_v16 = vadd.f32 %v275_v12, %v131_v13 }
 0x115   :  { %v134_v15 = vpop.f32.mrb[2].mxu0 }
 0x116   :  { %v135_v17 = vadd.f32 %v275_v12, %v134_v15  ;;  %v308_v18 = vpop.f32.mrb[3].mxu0 }
 0x118   :  { %v155_v19 = vpack.c.bf16 %v135_v17, %v132_v16 }
 0x11a   :  { %326 = vmatmul.mubr.bf16.vlgmr.msra.gmra.mrb[0].mxu1 %v155_v19 }
 0x1ed   :  { %v244_v21 = vpop.f32.mrb[0].mxu1 }
 0x1ee   :  { %v245_v22 = vadd.f32 %v280_v20, %v244_v21  ;;  %v327_v23 = vpop.f32.mrb[1].mxu1 }
 0x1ef   :  { %v247_v24 = vpop.f32.mrb[2].mxu1 }
 0x1f0   :  { %v251_v25 = vmul.f32 0.01, %v245_v22  ;;  %v248_v26 = vadd.f32 %v280_v20, %v247_v24  ;;  %v328_v27 = vpop.f32.mrb[3].mxu1 }
 0x1f2   :  { %v253_v28 = vmax.f32 %v245_v22, %v251_v25  ;;  %v252_v29 = vmul.f32 0.01, %v248_v26 }
 0x1f4   :  { %255 = vst [vmem:[#allocation8] sm:$0xff] %v253_v28  ;;  %v254_v30 = vmax.f32 %v248_v26, %v252_v29 }
 0x1f6   :  { %256 = vst [vmem:[#allocation8 + $0x8] sm:$0xff] %v254_v30 }
 0x1f7   :  { %427 = shalt.err (!%p424_p0)
}
 0x1f8   :  { %s428_s10 = scalar_lea.hbm %s559_s5, 256 }
 0x1f9   :  { %p429_p1 = scmp.ne.s32.totalorder %s559_s5, %s428_s10  ;;  %p432_p2 = scmp.lt.u32.totalorder %s428_s10, %s559_s5 }
 0x1fb   :  { %p434_p3 = pnand %p432_p2, %p429_p1 }
 0x1fd   :  { %437 = shalt.err (!%p434_p3)
}
 0x1fe   :  { %s452_s15 = smov 128   ;;  %s453_s16 = smov 8  }
 0x1ff   :  { %268 = dma.vmem_to_hbm [thread:$0]  %s263_s7, 256, %s559_s5, [#allocation4], %s452_s15, %s452_s15, %s453_s16  }
 0x200   :  { %442 = dma.done.wait [#allocation4], 256  }
 0x201   :  { %443 = vsyncadd [#allocation4], 4294967040 }
 0x202   :  { %272 = vsyncpa [#allocation3], 1 }
 0x203   :  { %273 = vsyncpa [#allocation6], 1 }
 0x204   :  { %274 = vsyncpa [#allocation4], 1 }

// kernel: tpu_custom_call.1
= control target key start
LH: loop header
LB: loop body
LE: loop exit
PB: predicated region body
PF: predicated region fallthrough
CT: control target
= control target key end

     0   :  { %10 = vsyncpa [#allocation3], 0  ;;  %s554_s0 = inlined_call_operand.hbm [shape: bf16[16,32], index: 0, kind: input, shape index: {}]   ;;  %s555_s1 = inlined_call_operand.hbm [shape: bf16[32,128], index: 1, kind: input, shape index: {}]   ;;  %s556_s2 = inlined_call_operand.vmem [shape: f32[1,128], index: 2, kind: input, shape index: {}]   ;;  %s557_s3 = inlined_call_operand.hbm [shape: bf16[128,128], index: 3, kind: input, shape index: {}]   ;;  %s558_s4 = inlined_call_operand.vmem [shape: f32[1,128], index: 4, kind: input, shape index: {}]   ;;  %s559_s5 = inlined_call_operand.hbm [shape: f32[16,128], index: 5, kind: output, shape index: {}]  }
   0x1   :  { %11 = vsyncpa [#allocation6], 0 }
   0x2   :  { %12 = vsyncpa [#allocation4], 0  ;;  %s444_s18 = smov [#allocation5]   ;;  %s445_s20 = smov [#allocation2]  }
   0x3   :  { %s30_s19 = sshll.u32 %s444_s18, 4  ;;  %s18_s21 = sshll.u32 %s445_s20, 4  ;;  %s31_s19 = int_to_ptr.vmem [resolvable:$true] %s30_s19  ;;  %s484_s21 = int_to_ptr.vmem [resolvable:$true] %s18_s21 }
   0x4   :  { %s350_s24 = scalar_lea.hbm %s555_s1, 256 }
   0x5   :  { %p351_p0 = scmp.ne.s32.totalorder %s555_s1, %s350_s24  ;;  %p354_p1 = scmp.lt.u32.totalorder %s350_s24, %s555_s1 }
   0x7   :  { %p356_p2 = pnand %p354_p1, %p351_p0 }
   0x9   :  { %359 = shalt.err (!%p356_p2)
}
   0xa   :  { %s360_s29 = scalar_lea.vmem %s31_s19, 256  ;;  %p365_p4 = scmp.lt.s32.totalorder %s31_s19, %s31_s19 }
   0xb   :  { %p361_p3 = scmp.ne.s32.totalorder %s31_s19, %s360_s29  ;;  %p366_p5 = scmp.lt.s32.totalorder %s360_s29, %s360_s29 }
   0xd   :  { %p367_p6 = por %p366_p5, %p365_p4 }
   0xf   :  { %p368_p7 = pnand %p367_p6, %p361_p3 }
  0x11   :  { %371 = shalt.err (!%p368_p7)
}
  0x12   :  { %s446_s30 = smov 64   ;;  %s447_s6 = smov 4  }
  0x13   :  { %36 = dma.hbm_to_vmem [thread:$0]  %s555_s1, 256, %s31_s19, [#allocation6], %s446_s30, %s446_s30, %s447_s6  }
  0x14   :  { %s372_s11 = scalar_lea.hbm %s554_s0, 128 }
  0x15   :  { %p373_p8 = scmp.ne.s32.totalorder %s554_s0, %s372_s11  ;;  %p376_p9 = scmp.lt.u32.totalorder %s372_s11, %s554_s0 }
  0x17   :  { %p378_p10 = pnand %p376_p9, %p373_p8 }
  0x19   :  { %381 = shalt.err (!%p378_p10)
}
  0x1a   :  { %s382_s16 = scalar_lea.vmem %s484_s21, 128  ;;  %p387_p12 = scmp.lt.s32.totalorder %s484_s21, %s484_s21 }
  0x1b   :  { %p383_p11 = scmp.ne.s32.totalorder %s484_s21, %s382_s16  ;;  %p388_p13 = scmp.lt.s32.totalorder %s382_s16, %s382_s16 }
  0x1d   :  { %p389_p0 = por %p388_p13, %p387_p12 }
  0x1f   :  { %p390_p1 = pnand %p389_p0, %p383_p11 }
  0x21   :  { %393 = shalt.err (!%p390_p1)
}
  0x22   :  { %24 = dma.hbm_to_vmem [thread:$0]  %s554_s0, 128, %s484_s21, [#allocation3], %s446_s30, %s446_s30, %s447_s6  }
  0x23   :  { %s448_s18 = smov [#allocation7]   ;;  %s394_s23 = scalar_lea.hbm %s557_s3, 1024 }
  0x24   :  { %s44_s19 = sshll.u32 %s448_s18, 4  ;;  %p395_p2 = scmp.ne.s32.totalorder %s557_s3, %s394_s23  ;;  %s45_s19 = int_to_ptr.vmem [resolvable:$true] %s44_s19 }
  0x25   :  { %p398_p3 = scmp.lt.u32.totalorder %s394_s23, %s557_s3 }
  0x27   :  { %p400_p4 = pnand %p398_p3, %p395_p2 }
  0x29   :  { %403 = shalt.err (!%p400_p4)
}
  0x2a   :  { %s404_s28 = scalar_lea.vmem %s45_s19, 1024  ;;  %p409_p6 = scmp.lt.s32.totalorder %s45_s19, %s45_s19 }
  0x2b   :  { %p405_p5 = scmp.ne.s32.totalorder %s45_s19, %s404_s28  ;;  %p410_p7 = scmp.lt.s32.totalorder %s404_s28, %s404_s28 }
  0x2d   :  { %p411_p8 = por %p410_p7, %p409_p6 }
  0x2f   :  { %p412_p9 = pnand %p411_p8, %p405_p5 }
  0x31   :  { %415 = shalt.err (!%p412_p9)
}
  0x32   :  { %50 = dma.hbm_to_vmem [thread:$0]  %s557_s3, 1024, %s45_s19, [#allocation6], %s446_s30, %s446_s30, %s447_s6  }
  0x33   :  { %438 = dma.done.wait [#allocation3], 128  }
  0x34   :  { %439 = vsyncadd [#allocation3], 4294967168 }
  0x35   :  { %440 = dma.done.wait [#allocation6], 1280  }
  0x36   :  { %441 = vsyncadd [#allocation6], 4294966016  ;;  %v449_v0 = vmov 0.0   ;;  %vm450_vm0 = vmmov 0   ;;  %v339_v1 = vld [vmem:[#allocation5] sm:$0xff]   ;;  %v340_v2 = vld [vmem:[#allocation5 + $0x8] sm:$0xff]  }
  0x37   :  { %301 = vmatprep.subr.bf16.mxu0 %v449_v0  ;;  %305 = vmatprep.mubr.msk.bf16.mxu0 %vm450_vm0, %v449_v0  ;;  %v342_v3 = vld [vmem:[#allocation7] sm:$0xff]   ;;  %v341_v4 = vld [vmem:[#allocation2] sm:$0xff]   ;;  %vm93_vm1 = vcmask 261120   ;;  %v344_v6 = vld [vmem:[#allocation7 + $0x10] sm:$0xff]  }
  0x38   :  { %309 = vmatprep.subr.bf16.mxu1 %v449_v0  ;;  %325 = vmatprep.mubr.msk.bf16.mxu1 %vm450_vm0, %v449_v0  ;;  %v343_v5 = vld [vmem:[#allocation7 + $0x8] sm:$0xff]   ;;  %v345_v7 = vld [vmem:[#allocation7 + $0x18] sm:$0xff]   ;;  %v346_v8 = vld [vmem:[#allocation7 + $0x20] sm:$0xff]  }
  0x39   :  { %302 = vmatpush3.bf16.msra.mxu0 %v339_v1  ;;  %310 = vmatpush3.bf16.msra.mxu1 %v342_v3  ;;  %v347_v9 = vld [vmem:[#allocation7 + $0x28] sm:$0xff]   ;;  %v348_v10 = vld [vmem:[#allocation7 + $0x30] sm:$0xff]   ;;  %v349_v11 = vld [vmem:[#allocation7 + $0x38] sm:$0xff]  }
  0x3a   :  { %303 = vmatprep.subr.bf16.mxu0 %v449_v0  ;;  %311 = vmatprep.subr.bf16.mxu1 %v449_v0  ;;  %v275_v12 = vld [vmem:[%s556_s2] ss:$0 sm:$0xff]  ;;  %s451_s2 = smov [#allocation8]  }
  0x3b   :  { %v280_v20 = vld [vmem:[%s558_s4] ss:$0 sm:$0xff]  ;;  %s262_s7 = sshll.u32 %s451_s2, 4  ;;  %s263_s7 = int_to_ptr.vmem [resolvable:$true] %s262_s7 }
  0x3c   :  { %s416_s8 = scalar_lea.vmem %s263_s7, 256  ;;  %p421_p11 = scmp.lt.s32.totalorder %s263_s7, %s263_s7 }
  0x3d   :  { %304 = vmatpush3.bf16.msra.mxu0 %v340_v2  ;;  %312 = vmatpush3.bf16.msra.mxu1 %v343_v5  ;;  %p417_p10 = scmp.ne.s32.totalorder %s263_s7, %s416_s8  ;;  %p422_p12 = scmp.lt.s32.totalorder %s416_s8, %s416_s8 }
  0x3e   :  { %313 = vmatprep.subr.bf16.mxu1 %v449_v0 }
  0x3f   :  { %p423_p13 = por %p422_p12, %p421_p11 }
  0x40   :  { %306 = vmatmul.mubr.msk.bf16.vlgmr.msra.gmra.mrb[0].mxu0 %vm93_vm1, %v341_v4 }
  0x41   :  { %314 = vmatpush3.bf16.msra.mxu1 %v344_v6  ;;  %p424_p0 = pnand %p423_p13, %p417_p10 }
  0x42   :  { %315 = vmatprep.subr.bf16.mxu1 %v449_v0 }
  0x45   :  { %316 = vmatpush3.bf16.msra.mxu1 %v345_v7 }
  0x46   :  { %317 = vmatprep.subr.bf16.mxu1 %v449_v0 }
  0x49   :  { %318 = vmatpush3.bf16.msra.mxu1 %v346_v8 }
  0x4a   :  { %319 = vmatprep.subr.bf16.mxu1 %v449_v0 }
  0x4d   :  { %320 = vmatpush3.bf16.msra.mxu1 %v347_v9 }
  0x4e   :  { %321 = vmatprep.subr.bf16.mxu1 %v449_v0 }
  0x51   :  { %322 = vmatpush3.bf16.msra.mxu1 %v348_v10 }
  0x52   :  { %323 = vmatprep.subr.bf16.mxu1 %v449_v0 }
  0x55   :  { %324 = vmatpush3.bf16.msra.mxu1 %v349_v11 }
 0x113   :  { %v131_v13 = vpop.f32.mrb[0].mxu0 }
 0x114   :  { %v307_v14 = vpop.f32.mrb[1].mxu0  ;;  %v132_v16 = vadd.f32 %v275_v12, %v131_v13 }
 0x115   :  { %v134_v15 = vpop.f32.mrb[2].mxu0 }
 0x116   :  { %v135_v17 = vadd.f32 %v275_v12, %v134_v15  ;;  %v308_v18 = vpop.f32.mrb[3].mxu0 }
 0x118   :  { %v155_v19 = vpack.c.bf16 %v135_v17, %v132_v16 }
 0x11a   :  { %326 = vmatmul.mubr.bf16.vlgmr.msra.gmra.mrb[0].mxu1 %v155_v19 }
 0x1ed   :  { %v244_v21 = vpop.f32.mrb[0].mxu1 }
 0x1ee   :  { %v245_v22 = vadd.f32 %v280_v20, %v244_v21  ;;  %v327_v23 = vpop.f32.mrb[1].mxu1 }
 0x1ef   :  { %v247_v24 = vpop.f32.mrb[2].mxu1 }
 0x1f0   :  { %v251_v25 = vmul.f32 0.01, %v245_v22  ;;  %v248_v26 = vadd.f32 %v280_v20, %v247_v24  ;;  %v328_v27 = vpop.f32.mrb[3].mxu1 }
 0x1f2   :  { %v253_v28 = vmax.f32 %v245_v22, %v251_v25  ;;  %v252_v29 = vmul.f32 0.01, %v248_v26 }
 0x1f4   :  { %255 = vst [vmem:[#allocation8] sm:$0xff] %v253_v28  ;;  %v254_v30 = vmax.f32 %v248_v26, %v252_v29 }
 0x1f6   :  { %256 = vst [vmem:[#allocation8 + $0x8] sm:$0xff] %v254_v30 }
 0x1f7   :  { %427 = shalt.err (!%p424_p0)
}
 0x1f8   :  { %s428_s10 = scalar_lea.hbm %s559_s5, 256 }
 0x1f9   :  { %p429_p1 = scmp.ne.s32.totalorder %s559_s5, %s428_s10  ;;  %p432_p2 = scmp.lt.u32.totalorder %s428_s10, %s559_s5 }
 0x1fb   :  { %p434_p3 = pnand %p432_p2, %p429_p1 }
 0x1fd   :  { %437 = shalt.err (!%p434_p3)
}
 0x1fe   :  { %s452_s15 = smov 128   ;;  %s453_s16 = smov 8  }
 0x1ff   :  { %268 = dma.vmem_to_hbm [thread:$0]  %s263_s7, 256, %s559_s5, [#allocation4], %s452_s15, %s452_s15, %s453_s16  }
 0x200   :  { %442 = dma.done.wait [#allocation4], 256  }
 0x201   :  { %443 = vsyncadd [#allocation4], 4294967040 }
 0x202   :  { %272 = vsyncpa [#allocation3], 1 }
 0x203   :  { %273 = vsyncpa [#allocation6], 1 }
 0x204   :  { %274 = vsyncpa [#allocation4], 1 }

</bundles_post_ra>
